<compile_context>
chip_gen: v7x
topology: tpu7x:2x2x1
jax: 0.10.0
libtpu: 0.0.40
codegen_flags: <defaults>
</compile_context>

<pallas_src>
import functools
import math

import jax
import jax.numpy as jnp
from jax.experimental import pallas as pl
from jax.experimental.pallas import tpu as pltpu


def _round_up(n, m):
    return (n + m - 1) // m * m


# ----------------------------------------------------------------------------
# Fused kernel: clamp + normalize + Fourier features + Linear(dim+1 -> D_out)
# ----------------------------------------------------------------------------
def _number_conditioner_kernel(x_ref, wfph_ref, wsc_ref, wxb_ref, o_ref,
                               *, min_val, max_val, inv_range):
    # x_ref   : (Bt, 1)       raw floats, batch tile on sublanes
    # wfph_ref: (2, dim)      row 0: [w, w] * 2*pi ; row 1: [0..0, pi/2..pi/2]
    #                         (sin(t + pi/2) == cos(t) -> no concat / relayout in-kernel)
    # wsc_ref : (dim, D_out)  Linear weight columns for the [sin | cos] features
    # wxb_ref : (2, D_out)    row 0: Linear weight column for raw x ; row 1: bias
    # o_ref   : (Bt, D_out)   lane-dense (D_out multiple of 128) -> unmasked stores
    x = jnp.clip(x_ref[...], min_val, max_val)
    x = (x - min_val) * inv_range                               # (Bt, 1) in [0, 1]

    wfph = wfph_ref[...]
    feats = jnp.sin(x * wfph[0:1, :] + wfph[1:2, :])            # (Bt, dim) = [sin | cos]

    acc = jnp.dot(feats, wsc_ref[...],
                  preferred_element_type=jnp.float32)           # single MXU matmul
    wxb = wxb_ref[...]
    acc = acc + x * wxb[0:1, :] + wxb[1:2, :]                   # rank-1 x term + bias
    o_ref[...] = acc.astype(o_ref.dtype)


# ----------------------------------------------------------------------------
# Tiling policy
# ----------------------------------------------------------------------------
_MAX_TILE = 1024   # ~1.5 KiB f32 of live VMEM per row (x + feats + out) -> far below limits


def _choose_tiling(batch, batch_tile=None):
    """Returns (bt, b_pad) with bt % 8 == 0 and b_pad % bt == 0."""
    batch = max(int(batch), 1)
    if batch_tile is not None:
        bt = _round_up(int(batch_tile), 8)          # keep (8,128) BlockSpec divisibility
        return bt, _round_up(batch, bt)
    b_pad = _round_up(batch, 8)
    if b_pad <= _MAX_TILE:
        return b_pad, b_pad                         # single grid step
    # Multiple grid steps: even number of tiles so v7x's 2 TensorCores stay balanced.
    n_tiles = _round_up(pl.cdiv(b_pad, _MAX_TILE), 2)
    bt = _round_up(pl.cdiv(b_pad, n_tiles), 8)
    return bt, n_tiles * bt


# ----------------------------------------------------------------------------
# One-dispatch forward (pad + pallas_call + slice + unsqueeze under a single jit)
# ----------------------------------------------------------------------------
@functools.partial(jax.jit, static_argnames=("b_pad", "bt", "min_val", "max_val"))
def _number_conditioner_fwd(floats, wfph, wsc, wxb, *, b_pad, bt, min_val, max_val):
    """floats: (B,) f32. Cached params: wfph (2, dim), wsc (dim, D_out), wxb (2, D_out).
    Returns (B, 1, D_out) f32 embeddings (already unsqueezed)."""
    B = floats.shape[0]
    dim = wfph.shape[1]
    d_out = wsc.shape[1]

    x = floats.astype(jnp.float32)
    if B != b_pad:                                  # aligned-batch fast path skips the pad
        x = jnp.pad(x, (0, b_pad - B))
    x = x.reshape(b_pad, 1)                         # batch already on sublanes

    inv_range = 1.0 / (float(max_val) - float(min_val))

    out = pl.pallas_call(
        functools.partial(_number_conditioner_kernel,
                          min_val=float(min_val), max_val=float(max_val),
                          inv_range=inv_range),
        out_shape=jax.ShapeDtypeStruct((b_pad, d_out), jnp.float32),
        grid_spec=pltpu.PrefetchScalarGridSpec(
            num_scalar_prefetch=0,
            grid=(b_pad // bt,),
            in_specs=[
                pl.BlockSpec((bt, 1), lambda i: (i, 0)),
                pl.BlockSpec((2, dim), lambda i: (0, 0)),
                pl.BlockSpec((dim, d_out), lambda i: (0, 0)),
                pl.BlockSpec((2, d_out), lambda i: (0, 0)),
            ],
            out_specs=pl.BlockSpec((bt, d_out), lambda i: (i, 0)),
        ),
        compiler_params=pltpu.CompilerParams(
            dimension_semantics=("parallel",),
        ),
    )(x, wfph, wsc, wxb)

    if B != b_pad:                                  # aligned-batch fast path skips the slice
        out = out[:B]
    return out[:, None, :]                          # (B, 1, D_out)


# ----------------------------------------------------------------------------
# Constant operand packing (done once, cached on device)
# ----------------------------------------------------------------------------
def pack_number_embedder_params(fourier_w, lin_w, lin_b):
    """fourier_w: (half_dim,). lin_w: (D_out, 2*half_dim+1) in PyTorch nn.Linear layout.
    lin_b: (D_out,). Returns (wfph (2, dim), wsc (dim, D_out), wxb (2, D_out))."""
    half_dim = int(fourier_w.shape[0])
    d_out = int(lin_w.shape[0])
    assert lin_w.shape == (d_out, 2 * half_dim + 1)

    two_pi = 2.0 * math.pi
    wf = jnp.concatenate([fourier_w, fourier_w]).astype(jnp.float32) * two_pi
    ph = jnp.concatenate([jnp.zeros((half_dim,), jnp.float32),
                          jnp.full((half_dim,), 0.5 * math.pi, jnp.float32)])
    wfph = jnp.stack([wf, ph])                                      # (2, dim)
    wsc = jnp.transpose(lin_w[:, 1:]).astype(jnp.float32)           # (dim, D_out)
    wxb = jnp.stack([lin_w[:, 0].astype(jnp.float32),
                     lin_b.astype(jnp.float32)])                    # (2, D_out)
    return wfph, wsc, wxb


# ----------------------------------------------------------------------------
# Module wrapper reproducing NumberConditioner.forward
# ----------------------------------------------------------------------------
class NumberConditionerPallas:
    """JAX/Pallas port of stable_audio_tools NumberConditioner.

    NumberEmbedder(features=output_dim) == TimePositionalEmbedding(dim=256, out=output_dim)
        == LearnedPositionalEmbedding(256) -> nn.Linear(257, output_dim).
    Conditioner(output_dim, output_dim) => proj_out = nn.Identity (and forward never uses it).
    """

    def __init__(self, key, *, output_dim=128, min_val=0.0, max_val=1.0, embed_dim=256):
        assert embed_dim % 2 == 0
        self.dim = output_dim
        self.output_dim = output_dim
        self.min_val = float(min_val)
        self.max_val = float(max_val)
        half_dim = embed_dim // 2

        k_w, k_lw, k_lb = jax.random.split(key, 3)
        # LearnedPositionalEmbedding.weights ~ N(0, 1)
        self.fourier_w = jax.random.normal(k_w, (half_dim,), jnp.float32)
        # nn.Linear(embed_dim + 1, output_dim) default init: U(-k, k), k = 1/sqrt(fan_in)
        k = 1.0 / math.sqrt(embed_dim + 1)
        self.lin_w = jax.random.uniform(k_lw, (output_dim, embed_dim + 1), jnp.float32, -k, k)
        self.lin_b = jax.random.uniform(k_lb, (output_dim,), jnp.float32, -k, k)

        # Hoisted constant operand prep, cached as device arrays (perf review item #1/#2).
        wfph, wsc, wxb = pack_number_embedder_params(self.fourier_w, self.lin_w, self.lin_b)
        self.wfph = jax.device_put(wfph)
        self.wsc = jax.device_put(wsc)
        self.wxb = jax.device_put(wxb)

    def forward(self, floats, *, batch_tile=None):
        # floats: python list of numbers (host side, like the torch module)
        floats = jnp.asarray([float(v) for v in floats], jnp.float32)
        B = int(floats.shape[0])
        bt, b_pad = _choose_tiling(B, batch_tile)
        float_embeds = _number_conditioner_fwd(
            floats, self.wfph, self.wsc, self.wxb,
            b_pad=b_pad, bt=bt, min_val=self.min_val, max_val=self.max_val)   # (B, 1, D_out)
        mask = jnp.ones((B, 1), jnp.float32)                                  # torch.ones(B, 1)
        return [float_embeds, mask]


# ----------------------------------------------------------------------------
# Pure-JAX reference (literal transcription of the PyTorch math) for verification
# ----------------------------------------------------------------------------
def _reference(floats, fourier_w, lin_w, lin_b, *, min_val, max_val):
    x = jnp.clip(jnp.asarray([float(v) for v in floats], jnp.float32), min_val, max_val)
    x = (x - min_val) / (max_val - min_val)
    freqs = x[:, None] * fourier_w[None, :] * (2.0 * math.pi)
    fouriered = jnp.concatenate([x[:, None], jnp.sin(freqs), jnp.cos(freqs)], axis=-1)
    emb = jnp.dot(fouriered, lin_w.T, precision=jax.lax.Precision.HIGHEST) + lin_b[None, :]
    return emb[:, None, :]


if __name__ == "__main__":
    key = jax.random.PRNGKey(0)
    cond = NumberConditionerPallas(key, output_dim=128, min_val=0.0, max_val=10.0,
                                   embed_dim=256)

    # Case 1: unaligned batch (padded path); out-of-range values exercise the clamp.
    floats_a = [0.5, 3.25, 7.0, 12.5, -1.0]
    emb_a, mask_a = cond.forward(floats_a)
    emb_a = jax.block_until_ready(emb_a)
    mask_a = jax.block_until_ready(mask_a)
    ref_a = _reference(floats_a, cond.fourier_w, cond.lin_w, cond.lin_b,
                       min_val=cond.min_val, max_val=cond.max_val)
    assert emb_a.shape == (5, 1, 128), emb_a.shape
    assert mask_a.shape == (5, 1), mask_a.shape
    assert jnp.allclose(emb_a, ref_a, atol=1e-4, rtol=1e-4), \
        float(jnp.max(jnp.abs(emb_a - ref_a)))
    assert bool(jnp.all(mask_a == 1.0))

    # Case 2: 8-aligned batch (pad/slice-free fast path).
    floats_b = [float(v) for v in
                jax.random.uniform(jax.random.PRNGKey(1), (8,), minval=-2.0, maxval=12.0)]
    emb_b, mask_b = cond.forward(floats_b)
    emb_b = jax.block_until_ready(emb_b)
    ref_b = _reference(floats_b, cond.fourier_w, cond.lin_w, cond.lin_b,
                       min_val=cond.min_val, max_val=cond.max_val)
    assert emb_b.shape == (8, 1, 128), emb_b.shape
    assert mask_b.shape == (8, 1), mask_b.shape
    assert jnp.allclose(emb_b, ref_b, atol=1e-4, rtol=1e-4), \
        float(jnp.max(jnp.abs(emb_b - ref_b)))

    # Case 3: explicit batch_tile -> multi-step parallel grid (grid length 3).
    floats_c = [float(v) for v in
                jax.random.uniform(jax.random.PRNGKey(2), (24,), minval=0.0, maxval=10.0)]
    emb_c, _ = cond.forward(floats_c, batch_tile=8)
    emb_c = jax.block_until_ready(emb_c)
    ref_c = _reference(floats_c, cond.fourier_w, cond.lin_w, cond.lin_b,
                       min_val=cond.min_val, max_val=cond.max_val)
    assert emb_c.shape == (24, 1, 128), emb_c.shape
    assert jnp.allclose(emb_c, ref_c, atol=1e-4, rtol=1e-4), \
        float(jnp.max(jnp.abs(emb_c - ref_c)))

    print("KERNEL_OK")
</pallas_src>

<mosaic_0001>
module attributes {stable_mosaic.version = 11 : i64} {
  func.func @_number_conditioner_kernel(%arg0: i32, %arg1: memref<8x1xf32, #tpu.memory_space<vmem>>, %arg2: memref<2x256xf32, #tpu.memory_space<vmem>>, %arg3: memref<256x128xf32, #tpu.memory_space<vmem>>, %arg4: memref<2x128xf32, #tpu.memory_space<vmem>>, %arg5: memref<8x128xf32, #tpu.memory_space<vmem>>) attributes {dimension_semantics = [#tpu.dimension_semantics<parallel>], iteration_bounds = array<i64: 1>, scalar_prefetch = 0 : i64, scratch_operands = 0 : i64, tpu.core_type = #tpu.core_type<tc>, window_params = [{transform_indices = @transform_0, window_bounds = array<i64: 8, 1>}, {pipeline_mode = #tpu.pipeline_mode<synchronous>, transform_indices = @transform_1, window_bounds = array<i64: 2, 256>}, {pipeline_mode = #tpu.pipeline_mode<synchronous>, transform_indices = @transform_2, window_bounds = array<i64: 256, 128>}, {pipeline_mode = #tpu.pipeline_mode<synchronous>, transform_indices = @transform_3, window_bounds = array<i64: 2, 128>}, {transform_indices = @transform_4, window_bounds = array<i64: 8, 128>}]} {
    %c0 = arith.constant 0 : index
    %c0_0 = arith.constant 0 : index
    %0 = vector.load %arg1[%c0, %c0_0] : memref<8x1xf32, #tpu.memory_space<vmem>>, vector<8x1xf32>
    %cst = arith.constant 0.000000e+00 : f32
    %cst_1 = arith.constant 1.000000e+01 : f32
    %1 = vector.broadcast %cst : f32 to vector<8x1xf32>
    %2 = arith.maximumf %1, %0 : vector<8x1xf32>
    %3 = vector.broadcast %cst_1 : f32 to vector<8x1xf32>
    %4 = arith.minimumf %3, %2 : vector<8x1xf32>
    %cst_2 = arith.constant 0.000000e+00 : f32
    %5 = vector.broadcast %cst_2 : f32 to vector<8x1xf32>
    %6 = arith.subf %4, %5 : vector<8x1xf32>
    %cst_3 = arith.constant 1.000000e-01 : f32
    %7 = vector.broadcast %cst_3 : f32 to vector<8x1xf32>
    %8 = arith.mulf %6, %7 : vector<8x1xf32>
    %c0_4 = arith.constant 0 : index
    %c0_5 = arith.constant 0 : index
    %9 = vector.load %arg2[%c0_4, %c0_5] : memref<2x256xf32, #tpu.memory_space<vmem>>, vector<2x256xf32>
    %10 = vector.extract_strided_slice %9 {offsets = [0, 0], sizes = [1, 256], strides = [1, 1]} : vector<2x256xf32> to vector<1x256xf32>
    %11 = vector.broadcast %8 : vector<8x1xf32> to vector<8x256xf32>
    %12 = vector.broadcast %10 : vector<1x256xf32> to vector<8x256xf32>
    %13 = arith.mulf %11, %12 : vector<8x256xf32>
    %14 = vector.extract_strided_slice %9 {offsets = [1, 0], sizes = [1, 256], strides = [1, 1]} : vector<2x256xf32> to vector<1x256xf32>
    %15 = vector.broadcast %14 : vector<1x256xf32> to vector<8x256xf32>
    %16 = arith.addf %13, %15 : vector<8x256xf32>
    %17 = math.sin %16 : vector<8x256xf32>
    %c0_6 = arith.constant 0 : index
    %c0_7 = arith.constant 0 : index
    %18 = vector.load %arg3[%c0_6, %c0_7] : memref<256x128xf32, #tpu.memory_space<vmem>>, vector<256x128xf32>
    %cst_8 = arith.constant dense<0.000000e+00> : vector<8x128xf32>
    %19 = tpu.matmul %17, %18, %cst_8 {dimension_numbers = #tpu.dot_dimension_numbers<[1], [0], [0], [1], [0, 0, 1, 1], [], []>} : vector<8x256xf32>, vector<256x128xf32>, vector<8x128xf32> -> vector<8x128xf32>
    %c0_9 = arith.constant 0 : index
    %c0_10 = arith.constant 0 : index
    %20 = vector.load %arg4[%c0_9, %c0_10] : memref<2x128xf32, #tpu.memory_space<vmem>>, vector<2x128xf32>
    %21 = vector.extract_strided_slice %20 {offsets = [0, 0], sizes = [1, 128], strides = [1, 1]} : vector<2x128xf32> to vector<1x128xf32>
    %22 = vector.broadcast %8 : vector<8x1xf32> to vector<8x128xf32>
    %23 = vector.broadcast %21 : vector<1x128xf32> to vector<8x128xf32>
    %24 = arith.mulf %22, %23 : vector<8x128xf32>
    %25 = arith.addf %19, %24 : vector<8x128xf32>
    %26 = vector.extract_strided_slice %20 {offsets = [1, 0], sizes = [1, 128], strides = [1, 1]} : vector<2x128xf32> to vector<1x128xf32>
    %27 = vector.broadcast %26 : vector<1x128xf32> to vector<8x128xf32>
    %28 = arith.addf %25, %27 : vector<8x128xf32>
    %c0_11 = arith.constant 0 : index
    %c0_12 = arith.constant 0 : index
    %29 = vector.load %arg5[%c0_11, %c0_12] : memref<8x128xf32, #tpu.memory_space<vmem>>, vector<8x128xf32>
    tpu.vector_store %arg5[%c0_11, %c0_12], %28 {strides = array<i32>} : memref<8x128xf32, #tpu.memory_space<vmem>>, vector<8x128xf32>,
    return
  }
  func.func @transform_0(%arg0: i32) -> (i32, i32) {
    %c0_i32 = arith.constant 0 : i32
    %c0_i32_0 = arith.constant 0 : i32
    return %arg0, %c0_i32 : i32, i32
  }
  func.func @transform_1(%arg0: i32) -> (i32, i32) {
    %c0_i32 = arith.constant 0 : i32
    %c0_i32_0 = arith.constant 0 : i32
    %c0_i32_1 = arith.constant 0 : i32
    return %c0_i32, %c0_i32_0 : i32, i32
  }
  func.func @transform_2(%arg0: i32) -> (i32, i32) {
    %c0_i32 = arith.constant 0 : i32
    %c0_i32_0 = arith.constant 0 : i32
    %c0_i32_1 = arith.constant 0 : i32
    return %c0_i32, %c0_i32_0 : i32, i32
  }
  func.func @transform_3(%arg0: i32) -> (i32, i32) {
    %c0_i32 = arith.constant 0 : i32
    %c0_i32_0 = arith.constant 0 : i32
    %c0_i32_1 = arith.constant 0 : i32
    return %c0_i32, %c0_i32_0 : i32, i32
  }
  func.func @transform_4(%arg0: i32) -> (i32, i32) {
    %c0_i32 = arith.constant 0 : i32
    %c0_i32_0 = arith.constant 0 : i32
    return %arg0, %c0_i32 : i32, i32
  }
}

</mosaic_0001>

<bundles_post_ra>
// kernel: _number_conditioner_fwd.1
= control target key start
LH: loop header
LB: loop body
LE: loop exit
PB: predicated region body
PF: predicated region fallthrough
CT: control target
= control target key end

     0   :  { %9 = vsyncpa [#allocation3], 0  ;;  %s535_s15 = smov [#allocation2]   ;;  %s673_s0 = inlined_call_operand.vmem [shape: f32[8,1], index: 0, kind: input, shape index: {}]   ;;  %s674_s1 = inlined_call_operand.vmem [shape: f32[2,256], index: 1, kind: input, shape index: {}]   ;;  %s675_s2 = inlined_call_operand.hbm [shape: f32[256,128], index: 2, kind: input, shape index: {}]   ;;  %s676_s3 = inlined_call_operand.vmem [shape: f32[2,128], index: 3, kind: input, shape index: {}]   ;;  %s677_s4 = inlined_call_operand.vmem [shape: f32[8,128], index: 4, kind: output, shape index: {}]  }
   0x1   :  { %s19_s16 = sshll.u32 %s535_s15, 4  ;;  %s511_s19 = scalar_lea.hbm %s675_s2, 4096  ;;  %s20_s16 = int_to_ptr.vmem [resolvable:$true] %s19_s16 }
   0x2   :  { %p512_p0 = scmp.ne.s32.totalorder %s675_s2, %s511_s19  ;;  %p515_p1 = scmp.lt.u32.totalorder %s511_s19, %s675_s2 }
   0x4   :  { %p517_p2 = pnand %p515_p1, %p512_p0 }
   0x6   :  { %520 = shalt.err (!%p517_p2)
}
   0x7   :  { %s521_s24 = scalar_lea.vmem %s20_s16, 4096  ;;  %p526_p4 = scmp.lt.s32.totalorder %s20_s16, %s20_s16 }
   0x8   :  { %p522_p3 = scmp.ne.s32.totalorder %s20_s16, %s521_s24  ;;  %p527_p5 = scmp.lt.s32.totalorder %s521_s24, %s521_s24 }
   0xa   :  { %p528_p6 = por %p527_p5, %p526_p4 }
   0xc   :  { %p529_p7 = pnand %p528_p6, %p522_p3 }
   0xe   :  { %532 = shalt.err (!%p529_p7)
}
   0xf   :  { %s536_s25 = smov 128   ;;  %s537_s26 = smov 8  }
  0x10   :  { %25 = dma.hbm_to_vmem [thread:$0]  %s675_s2, 4096, %s20_s16, [#allocation3], %s536_s25, %s536_s25, %s537_s26  }
  0x11   :  { %533 = dma.done.wait [#allocation3], 4096  }
  0x12   :  { %534 = vsyncadd [#allocation3], 4294963200  ;;  %v538_v0 = vmov 0   ;;  %v31_v1 = vld [vmem:[%s673_s0] sm:$0xff]  ;;  %v307_v6 = vld [vmem:[#allocation2 + $0x88] sm:$0xff]  ;;  %v42_v53 = vlaneseq }
  0x13   :  { %502 = vset.pattern.permute.xlu0 %v538_v0  ;;  %v32_v2 = vmax.f32 %v31_v1, 0.0  ;;  %v306_v5 = vld [vmem:[#allocation2 + $0x80] sm:$0xff]  ;;  %v291_v9 = vld [vmem:[#allocation2 + $0x8] sm:$0xff]  ;;  %v308_v10 = vld [vmem:[#allocation2 + $0x90] sm:$0xff] }
  0x14   :  { %v290_v7 = vld [vmem:[#allocation2] sm:$0xff]  ;;  %v452_v8 = vpack.c.bf16 %v307_v6, %v306_v5  ;;  %v309_v11 = vld [vmem:[#allocation2 + $0x98] sm:$0xff]  ;;  %v292_v14 = vld [vmem:[#allocation2 + $0x10] sm:$0xff]  ;;  %v43_v54 = vshrl.u32 %v42_v53, 7 }
  0x15   :  { %v33_v3 = vmin.f32 %v32_v2, 10.0  ;;  %v454_v12 = vpack.c.bf16 %v291_v9, %v290_v7  ;;  %v456_v13 = vpack.c.bf16 %v309_v11, %v308_v10  ;;  %v293_v15 = vld [vmem:[#allocation2 + $0x18] sm:$0xff]  ;;  %v310_v16 = vld [vmem:[#allocation2 + $0xa0] sm:$0xff]  ;;  %v311_v17 = vld [vmem:[#allocation2 + $0xa8] sm:$0xff] }
  0x16   :  { %453 = vmatprep.subr.bf16.mxu0 %v452_v8  ;;  %v458_v18 = vpack.c.bf16 %v293_v15, %v292_v14  ;;  %v460_v19 = vpack.c.bf16 %v311_v17, %v310_v16  ;;  %v294_v20 = vld [vmem:[#allocation2 + $0x20] sm:$0xff]  ;;  %v295_v21 = vld [vmem:[#allocation2 + $0x28] sm:$0xff]  ;;  %v312_v22 = vld [vmem:[#allocation2 + $0xb0] sm:$0xff]  ;;  %v44_v55 = vsub.s32 0, %v43_v54  ;;  %v48_v56 = vsub.s32 2, %v43_v54 }
  0x17   :  { %v34_v4 = vmul.f32 0.1, %v33_v3  ;;  %455 = vmatpush3.bf16.msra.mxu0 %v454_v12  ;;  %v313_v23 = vld [vmem:[#allocation2 + $0xb8] sm:$0xff]  ;;  %v462_v24 = vpack.c.bf16 %v295_v21, %v294_v20  ;;  %v296_v26 = vld [vmem:[#allocation2 + $0x30] sm:$0xff]  ;;  %v314_v28 = vld [vmem:[#allocation2 + $0xc0] sm:$0xff]  ;;  %v588_v58 = vsub.s32 1, %v43_v54 }
  0x18   :  { %457 = vmatprep.subr.bf16.mxu0 %v456_v13  ;;  %v464_v25 = vpack.c.bf16 %v313_v23, %v312_v22  ;;  %v297_v27 = vld [vmem:[#allocation2 + $0x38] sm:$0xff]  ;;  %v315_v29 = vld [vmem:[#allocation2 + $0xc8] sm:$0xff]  ;;  %v298_v32 = vld [vmem:[#allocation2 + $0x40] sm:$0xff]  ;;  %v68_v59 = vsub.s32 3, %v43_v54 }
  0x19   :  { %38 = vperm.xlu0 %502, %v34_v4   ;;  %v466_v30 = vpack.c.bf16 %v297_v27, %v296_v26  ;;  %v468_v31 = vpack.c.bf16 %v315_v29, %v314_v28  ;;  %v299_v33 = vld [vmem:[#allocation2 + $0x48] sm:$0xff]  ;;  %v316_v34 = vld [vmem:[#allocation2 + $0xd0] sm:$0xff]  ;;  %v317_v35 = vld [vmem:[#allocation2 + $0xd8] sm:$0xff] }
  0x1a   :  { %v470_v36 = vpack.c.bf16 %v299_v33, %v298_v32  ;;  %v472_v37 = vpack.c.bf16 %v317_v35, %v316_v34  ;;  %v300_v38 = vld [vmem:[#allocation2 + $0x50] sm:$0xff]  ;;  %v301_v39 = vld [vmem:[#allocation2 + $0x58] sm:$0xff]  ;;  %v318_v40 = vld [vmem:[#allocation2 + $0xe0] sm:$0xff] }
  0x1b   :  { %459 = vmatpush3.bf16.msra.mxu0 %v458_v18  ;;  %v319_v41 = vld [vmem:[#allocation2 + $0xe8] sm:$0xff]  ;;  %v474_v42 = vpack.c.bf16 %v301_v39, %v300_v38  ;;  %v302_v44 = vld [vmem:[#allocation2 + $0x60] sm:$0xff]  ;;  %v320_v46 = vld [vmem:[#allocation2 + $0xf0] sm:$0xff]  ;;  %v540_v38 = vmov 2475754826  }
  0x1c   :  { %461 = vmatprep.subr.bf16.mxu0 %v460_v19  ;;  %v476_v43 = vpack.c.bf16 %v319_v41, %v318_v40  ;;  %v303_v45 = vld [vmem:[#allocation2 + $0x68] sm:$0xff]  ;;  %v321_v47 = vld [vmem:[#allocation2 + $0xf8] sm:$0xff]  ;;  %v304_v50 = vld [vmem:[#allocation2 + $0x70] sm:$0xff]  ;;  %v541_v40 = vmov 2131351028  }
  0x1d   :  { %v478_v48 = vpack.c.bf16 %v303_v45, %v302_v44  ;;  %v480_v49 = vpack.c.bf16 %v321_v47, %v320_v46  ;;  %v305_v51 = vld [vmem:[#allocation2 + $0x78] sm:$0xff]  ;;  %v35_v57 = vld [vmem:[%s674_s1] sm:$0xf]  ;;  %v542_v44 = vmov 2102212464  }
  0x1e   :  { %v482_v52 = vpack.c.bf16 %v305_v51, %v304_v50  ;;  %v45_v60 = vrot.slane %v35_v57, %v44_v55  ;;  %v49_v61 = vrot.slane %v35_v57, %v48_v56  ;;  %v593_v62 = vld [vmem:[%s676_s3] sm:$0x3]  ;;  %v65_v63 = vrot.slane %v35_v57, %v588_v58 }
  0x1f   :  { %463 = vmatpush3.bf16.msra.mxu0 %v462_v24  ;;  %v69_v0 = vrot.slane %v35_v57, %v68_v59  ;;  %v326_v3 = vrot.slane %v593_v62, %v44_v55  ;;  %v543_v47 = vmov 920167782   ;;  %v544_v50 = vmov 1326507024  }
  0x20   :  { %465 = vmatprep.subr.bf16.mxu0 %v464_v25  ;;  %v55_v1 = vrot.slane %v45_v60, %v44_v55  ;;  %v59_v2 = vrot.slane %v49_v61, %v44_v55  ;;  %v75_v4 = vrot.slane %v65_v63, %v588_v58 }
  0x21   :  { %v79_v5 = vrot.slane %v69_v0, %v588_v58 }
  0x23   :  { %467 = vmatpush3.bf16.msra.mxu0 %v466_v30 }
  0x24   :  { %469 = vmatprep.subr.bf16.mxu0 %v468_v31 }
  0x27   :  { %471 = vmatpush3.bf16.msra.mxu0 %v470_v36  ;;  %v539_v36 = vmov 683565275  }
  0x28   :  { %473 = vmatprep.subr.bf16.mxu0 %v472_v37 }
  0x2b   :  { %475 = vmatpush3.bf16.msra.mxu0 %v474_v42 }
  0x2c   :  { %477 = vmatprep.subr.bf16.mxu0 %v476_v43 }
  0x2f   :  { %479 = vmatpush3.bf16.msra.mxu0 %v478_v48 }
  0x30   :  { %481 = vmatprep.subr.bf16.mxu0 %v480_v49 }
  0x33   :  { %483 = vmatpush3.bf16.msra.mxu0 %v482_v52 }
  0x98   :  { %v39_v6 = vpop.permute.xlu0 %38 }
  0x99   :  { %v60_v7 = vmul.f32 %v55_v1, %v39_v6  ;;  %v61_v8 = vmul.f32 %v59_v2, %v39_v6  ;;  %v599_v9 = vmul.f32 %v326_v3, %v39_v6 }
  0x9b   :  { %v601_v10 = vadd.f32 %v75_v4, %v60_v7  ;;  %v603_v11 = vadd.f32 %v79_v5, %v61_v8 }
  0x9d   :  { %v85_v12 = vand.u32 2139095040, %v601_v10  ;;  %v189_v13 = vand.u32 2139095040, %v603_v11  ;;  %v186_v14 = vand.u32 2147483647, %v603_v11  ;;  %v82_v15 = vand.u32 2147483647, %v601_v10 }
  0x9e   :  { %vm188_vm14 = vcmp.lt.s32.totalorder %v603_v11, 0 }
  0x9f   :  { %v86_v16 = vshrl.u32 %v85_v12, 23  ;;  %v190_v17 = vshrl.u32 %v189_v13, 23  ;;  %v193_v20 = vand.u32 8388607, %v186_v14  ;;  %v89_v21 = vand.u32 8388607, %v82_v15 }
  0xa0   :  { %vm187_vm15 = vcmp.le.f32.partialorder %v186_v14, 0.7853982 }
  0xa1   :  { %v409_v18 = vadd.s32 4294967169, %v86_v16  ;;  %v413_v19 = vadd.s32 4294967169, %v190_v17  ;;  %v194_v24 = vor.u32 8388608, %v193_v20  ;;  %v90_v25 = vor.u32 8388608, %v89_v21 }
  0xa3   :  { %v92_v22 = vadd.s32 1, %v409_v18  ;;  %v196_v23 = vadd.s32 1, %v413_v19  ;;  %v617_v33 = vshll.u32 %v194_v24, 8  ;;  %v619_v34 = vshll.u32 %v90_v25, 8 }
  0xa5   :  { %vm93_vm0 = vcmp.gt.s32.totalorder %v92_v22, 0  ;;  %vm197_vm1 = vcmp.gt.s32.totalorder %v196_v23, 0 }
  0xa6   :  { %v94_v26 = vsel %vm93_vm0, %v92_v22, 0  ;;  %v198_v27 = vsel %vm197_vm1, %v196_v23, 0  ;;  %vm84_vm0 = vcmp.lt.s32.totalorder %v601_v10, 0  ;;  %vm83_vm1 = vcmp.le.f32.partialorder %v82_v15, 0.7853982 }
  0xa7   :  { %v613_v28 = vand.u32 31, %v94_v26  ;;  %v200_v29 = vand.u32 31, %v198_v27  ;;  %v199_v30 = vshrl.u32 %v198_v27, 5  ;;  %v615_v31 = vshrl.u32 %v94_v26, 5 }
  0xa9   :  { %v201_v32 = vsub.s32 32, %v200_v29  ;;  %v97_v35 = vsub.s32 32, %v613_v28  ;;  %v203_v37 = vshll.u32 %v539_v36, %v200_v29  ;;  %v206_v39 = vshll.u32 %v540_v38, %v200_v29 }
  0xaa   :  { %v209_v41 = vshll.u32 %v541_v40, %v200_v29  ;;  %v212_v46 = vshll.u32 %v542_v44, %v200_v29  ;;  %v215_v49 = vshll.u32 %v543_v47, %v200_v29  ;;  %vm218_vm2 = vcmp.lt.s32.totalorder %v199_v30, 1 }
  0xab   :  { %v204_v42 = vshrl.u32 %v540_v38, %v201_v32  ;;  %v207_v43 = vshrl.u32 %v541_v40, %v201_v32  ;;  %v210_v45 = vshrl.u32 %v542_v44, %v201_v32  ;;  %v213_v48 = vshrl.u32 %v543_v47, %v201_v32 }
  0xac   :  { %v216_v51 = vshrl.u32 %v544_v50, %v201_v32  ;;  %v202_v52 = vshrl.u32 %v539_v36, %v201_v32  ;;  %vm220_vm3 = vcmp.lt.s32.totalorder %v199_v30, 3  ;;  %vm221_vm4 = vcmp.lt.s32.totalorder %v199_v30, 4 }
  0xad   :  { %v205_v53 = vor.u32 %v204_v42, %v203_v37  ;;  %v208_v54 = vor.u32 %v207_v43, %v206_v39  ;;  %v211_v55 = vor.u32 %v210_v45, %v209_v41  ;;  %v214_v56 = vor.u32 %v213_v48, %v212_v46 }
  0xae   :  { %v217_v57 = vor.u32 %v216_v51, %v215_v49  ;;  %v100_v3 = vshrl.u32 %v540_v38, %v97_v35  ;;  %vm219_vm5 = vcmp.lt.s32.totalorder %v199_v30, 2  ;;  %v99_v6 = vshll.u32 %v539_v36, %v613_v28 }
  0xaf   :  { %v222_v59 = vsel %vm218_vm2, %v202_v52, %v205_v53  ;;  %v223_v60 = vsel %vm221_vm4, %v211_v55, 2102212464  ;;  %v226_v61 = vsel %vm218_vm2, %v205_v53, %v208_v54  ;;  %v230_v63 = vsel %vm218_vm2, %v208_v54, %v211_v55 }
  0xb0   :  { %v224_v0 = vsel %vm220_vm3, %v208_v54, %v223_v60  ;;  %v227_v1 = vsel %vm221_vm4, %v214_v56, 920167782  ;;  %v231_v2 = vsel %vm221_vm4, %v217_v57, 1326507024  ;;  %v102_v13 = vshll.u32 %v540_v38, %v613_v28 }
  0xb1   :  { %v228_v4 = vsel %vm220_vm3, %v211_v55, %v227_v1  ;;  %v232_v5 = vsel %vm220_vm3, %v214_v56, %v231_v2  ;;  %v225_v7 = vsel %vm219_vm5, %v222_v59, %v224_v0  ;;  %v101_v20 = vor.u32 %v100_v3, %v99_v6 }
  0xb2   :  { %v229_v8 = vsel %vm219_vm5, %v226_v61, %v228_v4  ;;  %v233_v12 = vsel %vm219_vm5, %v230_v63, %v232_v5  ;;  %v103_v21 = vshrl.u32 %v541_v40, %v97_v35  ;;  %v105_v22 = vshll.u32 %v541_v40, %v613_v28 }
  0xb3   :  { %v625_v16 = vmul.u32.u64.low %v617_v33, %v233_v12  ;;  %v626_v17 = vmul.u32.u64.high %v617_v33, %v233_v12, %v625_v16  ;;  %v629_v18 = vmul.u32.u64.low %v617_v33, %v229_v8  ;;  %v630_v19 = vmul.u32.u64.high %v617_v33, %v229_v8, %v629_v18 }
  0xb4   :  { %v106_v23 = vshrl.u32 %v542_v44, %v97_v35  ;;  %v98_v24 = vshrl.u32 %v539_v36, %v97_v35  ;;  %v108_v25 = vshll.u32 %v542_v44, %v613_v28  ;;  %v109_v26 = vshrl.u32 %v543_v47, %v97_v35 }
  0xb5   :  { %v112_v27 = vshrl.u32 %v544_v50, %v97_v35  ;;  %v241_v29 = vmul.u32 %v617_v33, %v225_v7  ;;  %v104_v30 = vor.u32 %v103_v21, %v102_v13  ;;  %v111_v37 = vshll.u32 %v543_v47, %v613_v28 }
  0xb6   :  { %v107_v32 = vor.u32 %v106_v23, %v105_v22  ;;  %vm243_vm6 = vc.u32 %v626_v17, %v629_v18  ;;  %v244_v38 = vadd.s32 1, %v630_v19  ;;  %v110_v39 = vor.u32 %v109_v26, %v108_v25 }
  0xb7   :  { %vm114_vm7 = vcmp.lt.s32.totalorder %v615_v31, 1  ;;  %v113_v40 = vor.u32 %v112_v27, %v111_v37  ;;  %vm116_vm8 = vcmp.lt.s32.totalorder %v615_v31, 3  ;;  %vm117_vm9 = vcmp.lt.s32.totalorder %v615_v31, 4 }
  0xb8   :  { %v122_v36 = vsel %vm114_vm7, %v101_v20, %v104_v30  ;;  %v245_v35 = vsel %vm243_vm6, %v244_v38, %v630_v19  ;;  %v119_v33 = vsel %vm117_vm9, %v107_v32, 2102212464  ;;  %v123_v41 = vsel %vm117_vm9, %v110_v39, 920167782 }
  0xb9   :  { %v126_v42 = vsel %vm114_vm7, %v104_v30, %v107_v32  ;;  %v246_v43 = vadd.s32 %v245_v35, %v241_v29  ;;  %vm115_vm10 = vcmp.lt.s32.totalorder %v615_v31, 2  ;;  %v124_v28 = vsel %vm116_vm8, %v107_v32, %v123_v41 }
  0xba   :  { %v127_v44 = vsel %vm117_vm9, %v113_v40, 1326507024  ;;  %v118_v45 = vsel %vm114_vm7, %v98_v24, %v101_v20  ;;  %v120_v46 = vsel %vm116_vm8, %v104_v30, %v119_v33  ;;  %v125_v47 = vsel %vm115_vm10, %v122_v36, %v124_v28 }
  0xbb   :  { %v128_v48 = vsel %vm116_vm8, %v110_v39, %v127_v44  ;;  %v247_v49 = vadd.s32 536870912, %v246_v43  ;;  %v644_v51 = vmul.u32.u64.low %v619_v34, %v125_v47  ;;  %v645_v52 = vmul.u32.u64.high %v619_v34, %v125_v47, %v644_v51 }
  0xbc   :  { %v129_v50 = vsel %vm115_vm10, %v126_v42, %v128_v48  ;;  %v121_v56 = vsel %vm115_vm10, %v118_v45, %v120_v46  ;;  %v242_v13 = vadd.s32 %v629_v18, %v626_v17  ;;  %vm278_vm5 = vweird.f32 %v603_v11 }
  0xbd   :  { %v648_v53 = vmul.u32.u64.low %v619_v34, %v129_v50  ;;  %v649_v54 = vmul.u32.u64.high %v619_v34, %v129_v50, %v648_v53  ;;  %v248_v55 = vshrl.u32 %v247_v49, 30  ;;  %v140_v31 = vadd.s32 1, %v645_v52 }
  0xbe   :  { %v137_v59 = vmul.u32 %v619_v34, %v121_v56  ;;  %vm174_vm9 = vweird.f32 %v601_v10 }
  0xbf   :  { %v249_v57 = vshll.u32 %v248_v55, 30  ;;  %vm139_vm11 = vc.u32 %v649_v54, %v644_v51  ;;  %v138_v37 = vadd.s32 %v644_v51, %v649_v54  ;;  %v272_v18 = vsub.s32 4, %v248_v55 }
  0xc0   :  { %v141_v61 = vsel %vm139_vm11, %v140_v31, %v645_v52 }
  0xc1   :  { %v250_v60 = vsub.s32 %v246_v43, %v249_v57  ;;  %v142_v63 = vadd.s32 %v141_v61, %v137_v59  ;;  %v273_v28 = vsel %vm188_vm14, %v272_v18, %v248_v55 }
  0xc2   :  { %v275_v46 = vsel %vm187_vm15, 0, %v273_v28 }
  0xc3   :  { %v252_v0 = vsub.s32 0, %v250_v60  ;;  %v143_v1 = vadd.s32 536870912, %v142_v63  ;;  %v279_v51 = vadd.s32 3, %v275_v46 }
  0xc5   :  { %v414_v2 = vmin.u32 %v252_v0, %v250_v60  ;;  %v144_v3 = vshrl.u32 %v143_v1, 30  ;;  %v280_v54 = vand.u32 3, %v279_v51 }
  0xc7   :  { %v254_v4 = vclz %v414_v2  ;;  %v145_v5 = vshll.u32 %v144_v3, 30  ;;  %v168_v50 = vsub.s32 4, %v144_v3  ;;  %vm285_vm2 = vcmp.eq.s32.totalorder %v280_v54, 2 }
  0xc8   :  { %vm282_vm3 = vcmp.eq.s32.totalorder %v280_v54, 0  ;;  %vm281_vm4 = vcmp.lt.s32.totalorder %v280_v54, 2 }
  0xc9   :  { %v415_v6 = vadd.s32 4294967294, %v254_v4  ;;  %v146_v7 = vsub.s32 %v142_v63, %v145_v5  ;;  %v169_v53 = vsel %vm84_vm0, %v168_v50, %v144_v3 }
  0xca   :  { %v171_v57 = vsel %vm83_vm1, 0, %v169_v53 }
  0xcb   :  { %vm416_vm12 = vcmp.lt.s32.totalorder %v415_v6, 0  ;;  %v148_v12 = vsub.s32 0, %v146_v7  ;;  %v175_v63 = vadd.s32 3, %v171_v57 }
  0xcc   :  { %v257_v8 = vsel %vm416_vm12, 0, %v415_v6 }
  0xcd   :  { %v258_v34 = vsub.s32 32, %v257_v8  ;;  %v262_v16 = vsub.s32 4294967266, %v257_v8  ;;  %v410_v19 = vmin.u32 %v148_v12, %v146_v7  ;;  %v259_v20 = vshll.u32 %v250_v60, %v257_v8 }
  0xce   :  { %v176_v2 = vand.u32 3, %v175_v63 }
  0xcf   :  { %v260_v21 = vshrl.u32 %v242_v13, %v258_v34  ;;  %v263_v22 = vadd.s32 127, %v262_v16  ;;  %v150_v23 = vclz %v410_v19  ;;  %v401_v16 = vrot.slane %v593_v62, %v588_v58 }
  0xd0   :  { %vm181_vm6 = vcmp.eq.s32.totalorder %v176_v2, 2  ;;  %vm178_vm7 = vcmp.eq.s32.totalorder %v176_v2, 0  ;;  %vm177_vm8 = vcmp.lt.s32.totalorder %v176_v2, 2 }
  0xd1   :  { %v261_v24 = vor.u32 %v260_v21, %v259_v20  ;;  %v264_v25 = vshll.u32 %v263_v22, 23  ;;  %v411_v26 = vadd.s32 4294967294, %v150_v23 }
  0xd3   :  { %v265_v27 = vor.u32 4788187, %v264_v25  ;;  %vm412_vm13 = vcmp.lt.s32.totalorder %v411_v26, 0  ;;  %v268_v30 = vcvt.s32.f32 %v261_v24 }
  0xd4   :  { %v153_v32 = vsel %vm412_vm13, 0, %v411_v26 }
  0xd5   :  { %v266_v29 = vand.u32 2147483647, %v265_v27  ;;  %v154_v38 = vsub.s32 32, %v153_v32  ;;  %v158_v39 = vsub.s32 4294967266, %v153_v32  ;;  %v155_v40 = vshll.u32 %v146_v7, %v153_v32 }
  0xd7   :  { %v269_v17 = vmul.f32 %v268_v30, %v266_v29  ;;  %v156_v36 = vshrl.u32 %v138_v37, %v154_v38  ;;  %v159_v35 = vadd.s32 127, %v158_v39 }
  0xd9   :  { %v270_v33 = vxor.u32 2147483648, %v269_v17  ;;  %v157_v41 = vor.u32 %v156_v36, %v155_v40  ;;  %v160_v42 = vshll.u32 %v159_v35, 23 }
  0xdb   :  { %v271_v43 = vsel %vm188_vm14, %v270_v33, %v269_v17  ;;  %v161_v45 = vor.u32 4788187, %v160_v42  ;;  %v164_v48 = vcvt.s32.f32 %v157_v41 }
  0xdc   :  { %v274_v44 = vsel %vm187_vm15, %v603_v11, %v271_v43 }
  0xdd   :  { %503 = vcosq.f32 %v274_v44  ;;  %v162_v47 = vand.u32 2147483647, %v161_v45 }
  0xde   :  { %505 = vsinq.f32 %v274_v44 }
  0xdf   :  { %v165_v49 = vmul.f32 %v164_v48, %v162_v47 }
  0xe1   :  { %v166_v52 = vxor.u32 2147483648, %v165_v49 }
  0xe3   :  { %v167_v14 = vsel %vm84_vm0, %v166_v52, %v165_v49 }
  0xe4   :  { %v170_v55 = vsel %vm83_vm1, %v601_v10, %v167_v14 }
  0xe5   :  { %507 = vcosq.f32 %v170_v55 }
  0xe6   :  { %509 = vsinq.f32 %v170_v55 }
  0xe7   :  { %v504_v56 = vpop.eup %503 }
  0xe8   :  { %v506_v31 = vpop.eup %505  ;;  %v286_v59 = vxor.u32 2147483648, %v504_v56 }
  0xe9   :  { %v283_v60 = vxor.u32 2147483648, %v506_v31 }
  0xea   :  { %v287_v61 = vsel %vm285_vm2, %v286_v59, %v506_v31 }
  0xeb   :  { %v284_v0 = vsel %vm282_vm3, %v504_v56, %v283_v60 }
  0xec   :  { %v288_v15 = vsel %vm281_vm4, %v284_v0, %v287_v61 }
  0xed   :  { %v289_v1 = vsel %vm278_vm5, nan, %v288_v15 }
  0xee   :  { %392 = vmatprep.mubr.f32.mxu0 %v289_v1 }
  0xef   :  { %v508_v3 = vpop.eup %507 }
  0xf0   :  { %v510_v4 = vpop.eup %509  ;;  %v182_v5 = vxor.u32 2147483648, %v508_v3 }
  0xf1   :  { %v179_v6 = vxor.u32 2147483648, %v510_v4 }
  0xf2   :  { %v183_v7 = vsel %vm181_vm6, %v182_v5, %v510_v4 }
  0xf3   :  { %v180_v8 = vsel %vm178_vm7, %v508_v3, %v179_v6 }
  0xf4   :  { %v184_v12 = vsel %vm177_vm8, %v180_v8, %v183_v7 }
  0xf5   :  { %v185_v13 = vsel %vm174_vm9, nan, %v184_v12 }
  0xf6   :  { %393 = vmatmul.mubr.f32.vlgmr.msra.gmra.mrb[0].mxu0 %v185_v13 }
 0x1c9   :  { %v449_v34 = vpop.f32.mrb[0].mxu0 }
 0x1ca   :  { %v450_v11 = vpop.f32.mrb[1].mxu0 }
 0x1cb   :  { %v451_v19 = vadd.f32 %v450_v11, %v449_v34 }
 0x1cd   :  { %v395_v20 = vadd.f32 %v451_v19, %v599_v9 }
 0x1cf   :  { %v402_v21 = vadd.f32 %v401_v16, %v395_v20 }
 0x1d1   :  { %403 = vst [vmem:[%s677_s4] sm:$0xff] %v402_v21 }
 0x1d2   :  { %408 = vsyncpa [#allocation3], 1 }

</bundles_post_ra>
